<compile_context>
chip_gen: v6e
topology: v6e:2x2x1
jax: 0.10.0
libtpu: 0.0.40
codegen_flags: <defaults>
</compile_context>

<pallas_src>
import functools
import jax
import jax.numpy as jnp
from jax.experimental import pallas as pl
from jax.experimental.pallas import tpu as pltpu

# ---------------- configuration (small, consistent with the module) ----------
IMG   = 16          # img_size
PATCH = 4           # patch_size
IN_CH = 3           # in_chans (module default)
EMBED = 32          # embed_dim (small)
BATCH = 2
EPS   = 1e-5        # nn.LayerNorm default eps

HP = IMG // PATCH
WP = IMG // PATCH
NUM_PATCHES = HP * WP
K = IN_CH * PATCH * PATCH          # im2col feature length per patch


# ------------------------------ Pallas kernel --------------------------------
def _patch_embed_kernel(p_ref, w_ref, b_ref, g_ref, beta_ref, o_ref, *, use_norm):
    # p_ref: (bm, K) im2col patches; w_ref: (K, E); b/g/beta: (1, E); o_ref: (bm, E)
    p = p_ref[...].astype(jnp.float32)
    y = jnp.dot(p, w_ref[...].astype(jnp.float32),
                preferred_element_type=jnp.float32) + b_ref[...]
    if use_norm:
        mu = jnp.mean(y, axis=-1, keepdims=True)
        var = jnp.mean((y - mu) ** 2, axis=-1, keepdims=True)
        y = (y - mu) * jax.lax.rsqrt(var + EPS)
        y = y * g_ref[...] + beta_ref[...]
    o_ref[...] = y.astype(o_ref.dtype)


# ----------------------------- kernel wrapper ---------------------------------
def patch_embed_pallas(patches, w_t, bias2d, gamma2d, beta2d, *, use_norm=True, bm=None):
    """patches: (M, K) im2col rows; w_t: (K, E); biases/affine already (1, E)."""
    M, Kdim = patches.shape
    E = w_t.shape[1]
    if bm is None:
        bm = M                      # whole problem in one grid step (fits VMEM easily)
    assert M % bm == 0
    kernel = functools.partial(_patch_embed_kernel, use_norm=use_norm)
    return pl.pallas_call(
        kernel,
        out_shape=jax.ShapeDtypeStruct((M, E), patches.dtype),
        grid=(M // bm,),
        in_specs=[
            pl.BlockSpec((bm, Kdim), lambda i: (i, 0)),
            pl.BlockSpec((Kdim, E), lambda i: (0, 0)),
            pl.BlockSpec((1, E), lambda i: (0, 0)),
            pl.BlockSpec((1, E), lambda i: (0, 0)),
            pl.BlockSpec((1, E), lambda i: (0, 0)),
        ],
        out_specs=pl.BlockSpec((bm, E), lambda i: (i, 0)),
        compiler_params=pltpu.CompilerParams(dimension_semantics=("parallel",)),
    )(patches, w_t, bias2d, gamma2d, beta2d)


# ------------------------------ glue (plain JAX) ------------------------------
def patchify(x, patch):
    """(B, C, H, W) -> (B*Hp*Wp, C*P*P), feature order (c, ph, pw) to match the
    flattened Conv2d weight (out, in, kh, kw)."""
    B, C, H, W = x.shape
    hp, wp = H // patch, W // patch
    x = x.reshape(B, C, hp, patch, wp, patch)
    x = x.transpose(0, 2, 4, 1, 3, 5)              # (B, hp, wp, C, P, P)
    return x.reshape(B * hp * wp, C * patch * patch)


def sw_patch_embed_forward(x, params, *, patch=PATCH, use_norm=True):
    """Equivalent of SWPatchEmbed.forward: x (B, C, H, W) -> (B, num_patches, embed_dim)."""
    B, C, H, W = x.shape
    assert H == IMG and W == IMG, "input image size doesn't match model"
    patches = patchify(x, patch)                   # single fused XLA reshape+transpose
    out = patch_embed_pallas(patches, params['w_t'], params['b2d'],
                             params['g2d'], params['beta2d'], use_norm=use_norm)
    return out.reshape(B, (H // patch) * (W // patch), -1)


# ------------------------------ pure-JAX reference ----------------------------
def reference_forward(x, params, *, use_norm=True):
    y = jax.lax.conv_general_dilated(
        x.astype(jnp.float32), params['w'].astype(jnp.float32),
        window_strides=(PATCH, PATCH), padding='VALID',
        dimension_numbers=('NCHW', 'OIHW', 'NCHW'),
        precision=jax.lax.Precision.HIGHEST)
    y = y + params['b'][None, :, None, None]
    Bn, E, hp, wp = y.shape
    y = y.reshape(Bn, E, hp * wp).transpose(0, 2, 1)      # flatten(2).transpose(1, 2)
    if use_norm:
        mu = y.mean(-1, keepdims=True)
        var = ((y - mu) ** 2).mean(-1, keepdims=True)
        y = (y - mu) / jnp.sqrt(var + EPS) * params['g'] + params['beta']
    return y


# --------------------------- deterministic parameters -------------------------
def make_params(key):
    ks = jax.random.split(key, 4)
    w = 0.05 * jax.random.normal(ks[0], (EMBED, IN_CH, PATCH, PATCH), jnp.float32)
    b = 0.05 * jax.random.normal(ks[1], (EMBED,), jnp.float32)
    g = 1.0 + 0.1 * jax.random.normal(ks[2], (EMBED,), jnp.float32)
    beta = 0.1 * jax.random.normal(ks[3], (EMBED,), jnp.float32)
    return {
        # torch-layout parameters (for the reference)
        'w': w, 'b': b, 'g': g, 'beta': beta,
        # kernel-ready parameters (transposed / reshaped ONCE at param prep)
        'w_t': w.reshape(EMBED, K).T,      # (K, E)
        'b2d': b.reshape(1, EMBED),
        'g2d': g.reshape(1, EMBED),
        'beta2d': beta.reshape(1, EMBED),
    }


# -------------------------------------- main ----------------------------------
if __name__ == "__main__":
    key = jax.random.PRNGKey(0)
    kx, kp = jax.random.split(key)
    x = jax.random.normal(kx, (BATCH, IN_CH, IMG, IMG), jnp.float32)
    params = make_params(kp)

    # norm_layer = LayerNorm path (as used by Swin when patch_norm=True)
    out = sw_patch_embed_forward(x, params, use_norm=True)
    out = jax.block_until_ready(out)
    assert out.shape == (BATCH, NUM_PATCHES, EMBED)
    ref = reference_forward(x, params, use_norm=True)
    if not bool(jnp.allclose(out, ref, atol=1e-4, rtol=1e-4)):
        raise AssertionError("Pallas output (norm path) does not match JAX reference")

    # norm_layer = None path (module default)
    out_nn = jax.block_until_ready(sw_patch_embed_forward(x, params, use_norm=False))
    ref_nn = reference_forward(x, params, use_norm=False)
    if not bool(jnp.allclose(out_nn, ref_nn, atol=1e-4, rtol=1e-4)):
        raise AssertionError("Pallas output (no-norm path) does not match JAX reference")

    print("KERNEL_OK")
</pallas_src>

<mosaic_0001>
module attributes {stable_mosaic.version = 11 : i64} {
  func.func @_patch_embed_kernel(%arg0: i32, %arg1: memref<32x48xf32, #tpu.memory_space<vmem>>, %arg2: memref<48x32xf32, #tpu.memory_space<vmem>>, %arg3: memref<1x32xf32, #tpu.memory_space<vmem>>, %arg4: memref<1x32xf32, #tpu.memory_space<vmem>>, %arg5: memref<1x32xf32, #tpu.memory_space<vmem>>, %arg6: memref<32x32xf32, #tpu.memory_space<vmem>>) attributes {dimension_semantics = [#tpu.dimension_semantics<parallel>], iteration_bounds = array<i64: 1>, scalar_prefetch = 0 : i64, scratch_operands = 0 : i64, tpu.core_type = #tpu.core_type<tc>, window_params = [{transform_indices = @transform_0, window_bounds = array<i64: 32, 48>}, {pipeline_mode = #tpu.pipeline_mode<synchronous>, transform_indices = @transform_1, window_bounds = array<i64: 48, 32>}, {pipeline_mode = #tpu.pipeline_mode<synchronous>, transform_indices = @transform_2, window_bounds = array<i64: 1, 32>}, {pipeline_mode = #tpu.pipeline_mode<synchronous>, transform_indices = @transform_3, window_bounds = array<i64: 1, 32>}, {pipeline_mode = #tpu.pipeline_mode<synchronous>, transform_indices = @transform_4, window_bounds = array<i64: 1, 32>}, {transform_indices = @transform_5, window_bounds = array<i64: 32, 32>}]} {
    %c0 = arith.constant 0 : index
    %c0_0 = arith.constant 0 : index
    %0 = vector.load %arg1[%c0, %c0_0] : memref<32x48xf32, #tpu.memory_space<vmem>>, vector<32x48xf32>
    %c0_1 = arith.constant 0 : index
    %c0_2 = arith.constant 0 : index
    %1 = vector.load %arg2[%c0_1, %c0_2] : memref<48x32xf32, #tpu.memory_space<vmem>>, vector<48x32xf32>
    %cst = arith.constant dense<0.000000e+00> : vector<32x32xf32>
    %2 = tpu.matmul %0, %1, %cst {dimension_numbers = #tpu.dot_dimension_numbers<[1], [0], [0], [1], [0, 0, 1, 1], [], []>} : vector<32x48xf32>, vector<48x32xf32>, vector<32x32xf32> -> vector<32x32xf32>
    %c0_3 = arith.constant 0 : index
    %c0_4 = arith.constant 0 : index
    %3 = vector.load %arg3[%c0_3, %c0_4] : memref<1x32xf32, #tpu.memory_space<vmem>>, vector<1x32xf32>
    %4 = vector.broadcast %3 : vector<1x32xf32> to vector<32x32xf32>
    %5 = arith.addf %2, %4 : vector<32x32xf32>
    %cst_5 = arith.constant dense<0.000000e+00> : vector<32xf32>
    %6 = vector.multi_reduction <add>, %5, %cst_5 [1] : vector<32x32xf32> to vector<32xf32>
    %7 = vector.shape_cast %6 : vector<32xf32> to vector<32x1xf32>
    %cst_6 = arith.constant 3.200000e+01 : f32
    %8 = vector.broadcast %cst_6 : f32 to vector<32x1xf32>
    %9 = arith.divf %7, %8 : vector<32x1xf32>
    %10 = vector.broadcast %9 : vector<32x1xf32> to vector<32x32xf32>
    %11 = arith.subf %5, %10 : vector<32x32xf32>
    %12 = arith.mulf %11, %11 : vector<32x32xf32>
    %cst_7 = arith.constant dense<0.000000e+00> : vector<32xf32>
    %13 = vector.multi_reduction <add>, %12, %cst_7 [1] : vector<32x32xf32> to vector<32xf32>
    %14 = vector.shape_cast %13 : vector<32xf32> to vector<32x1xf32>
    %cst_8 = arith.constant 3.200000e+01 : f32
    %15 = vector.broadcast %cst_8 : f32 to vector<32x1xf32>
    %16 = arith.divf %14, %15 : vector<32x1xf32>
    %17 = vector.broadcast %9 : vector<32x1xf32> to vector<32x32xf32>
    %18 = arith.subf %5, %17 : vector<32x32xf32>
    %cst_9 = arith.constant 9.99999974E-6 : f32
    %19 = vector.broadcast %cst_9 : f32 to vector<32x1xf32>
    %20 = arith.addf %16, %19 : vector<32x1xf32>
    %21 = math.rsqrt %20 : vector<32x1xf32>
    %22 = vector.broadcast %21 : vector<32x1xf32> to vector<32x32xf32>
    %23 = arith.mulf %18, %22 : vector<32x32xf32>
    %c0_10 = arith.constant 0 : index
    %c0_11 = arith.constant 0 : index
    %24 = vector.load %arg4[%c0_10, %c0_11] : memref<1x32xf32, #tpu.memory_space<vmem>>, vector<1x32xf32>
    %25 = vector.broadcast %24 : vector<1x32xf32> to vector<32x32xf32>
    %26 = arith.mulf %23, %25 : vector<32x32xf32>
    %c0_12 = arith.constant 0 : index
    %c0_13 = arith.constant 0 : index
    %27 = vector.load %arg5[%c0_12, %c0_13] : memref<1x32xf32, #tpu.memory_space<vmem>>, vector<1x32xf32>
    %28 = vector.broadcast %27 : vector<1x32xf32> to vector<32x32xf32>
    %29 = arith.addf %26, %28 : vector<32x32xf32>
    %c0_14 = arith.constant 0 : index
    %c0_15 = arith.constant 0 : index
    %30 = vector.load %arg6[%c0_14, %c0_15] : memref<32x32xf32, #tpu.memory_space<vmem>>, vector<32x32xf32>
    tpu.vector_store %arg6[%c0_14, %c0_15], %29 {strides = array<i32>} : memref<32x32xf32, #tpu.memory_space<vmem>>, vector<32x32xf32>,
    return
  }
  func.func @transform_0(%arg0: i32) -> (i32, i32) {
    %c0_i32 = arith.constant 0 : i32
    %c0_i32_0 = arith.constant 0 : i32
    return %arg0, %c0_i32 : i32, i32
  }
  func.func @transform_1(%arg0: i32) -> (i32, i32) {
    %c0_i32 = arith.constant 0 : i32
    %c0_i32_0 = arith.constant 0 : i32
    %c0_i32_1 = arith.constant 0 : i32
    return %c0_i32, %c0_i32_0 : i32, i32
  }
  func.func @transform_2(%arg0: i32) -> (i32, i32) {
    %c0_i32 = arith.constant 0 : i32
    %c0_i32_0 = arith.constant 0 : i32
    %c0_i32_1 = arith.constant 0 : i32
    return %c0_i32, %c0_i32_0 : i32, i32
  }
  func.func @transform_3(%arg0: i32) -> (i32, i32) {
    %c0_i32 = arith.constant 0 : i32
    %c0_i32_0 = arith.constant 0 : i32
    %c0_i32_1 = arith.constant 0 : i32
    return %c0_i32, %c0_i32_0 : i32, i32
  }
  func.func @transform_4(%arg0: i32) -> (i32, i32) {
    %c0_i32 = arith.constant 0 : i32
    %c0_i32_0 = arith.constant 0 : i32
    %c0_i32_1 = arith.constant 0 : i32
    return %c0_i32, %c0_i32_0 : i32, i32
  }
  func.func @transform_5(%arg0: i32) -> (i32, i32) {
    %c0_i32 = arith.constant 0 : i32
    %c0_i32_0 = arith.constant 0 : i32
    return %arg0, %c0_i32 : i32, i32
  }
}

</mosaic_0001>

<bundles_post_ra>
// kernel: tpu_custom_call.1
= control target key start
LH: loop header
LB: loop body
LE: loop exit
PB: predicated region body
PF: predicated region fallthrough
CT: control target
= control target key end

     0   :  { %s399_s0 = inlined_call_operand.vmem [shape: f32[32,48], index: 0, kind: input, shape index: {}]   ;;  %s400_s1 = inlined_call_operand.vmem [shape: f32[48,32], index: 1, kind: input, shape index: {}]   ;;  %s401_s2 = inlined_call_operand.vmem [shape: f32[1,32], index: 2, kind: input, shape index: {}]   ;;  %s402_s3 = inlined_call_operand.vmem [shape: f32[1,32], index: 3, kind: input, shape index: {}]   ;;  %s403_s4 = inlined_call_operand.vmem [shape: f32[1,32], index: 4, kind: input, shape index: {}]   ;;  %s404_s5 = inlined_call_operand.hbm [shape: f32[32,32], index: 5, kind: output, shape index: {}]  }
   0x1   :  { %v30_v0 = vld [vmem:[%s400_s1 + $0x28] sm:$0xff]  ;;  %v29_v1 = vld [vmem:[%s400_s1 + $0x20] sm:$0xff]  ;;  %v28_v2 = vld [vmem:[%s400_s1 + $0x18] sm:$0xff] }
   0x2   :  { %249 = vmatprep.subr.mxu0 %v30_v0  ;;  %267 = vmatprep.subr.mxu1 %v30_v0 }
   0x3   :  { %250 = vmatpush3.msra.mxu0 %v30_v0  ;;  %273 = vmatpush3.msra.mxu1 %v30_v0 }
   0x4   :  { %251 = vmatprep.subr.mxu0 %v29_v1  ;;  %268 = vmatprep.subr.mxu1 %v29_v1 }
   0x5   :  { %10 = vsyncpa [#allocation3], 0  ;;  %252 = vmatpush3.msra.mxu0 %v29_v1  ;;  %274 = vmatpush3.msra.mxu1 %v29_v1  ;;  %v27_v3 = vld [vmem:[%s400_s1 + $0x10] sm:$0xff]  ;;  %v26_v4 = vld [vmem:[%s400_s1 + $0x8] sm:$0xff]  ;;  %vm38_vm0 = vcmask 392192   ;;  %vm136_vm1 = vcmask 261120  }
   0x6   :  { %253 = vmatprep.subr.mxu0 %v28_v2  ;;  %269 = vmatprep.subr.mxu1 %v28_v2  ;;  %v25_v5 = vld [vmem:[%s400_s1] sm:$0xff]  ;;  %v23_v7 = vld [vmem:[%s399_s0 + $0x10] sm:$0xff]  ;;  %v22_v8 = vld [vmem:[%s399_s0 + $0x8] sm:$0xff] }
   0x7   :  { %254 = vmatpush3.msra.mxu0 %v28_v2  ;;  %275 = vmatpush3.msra.mxu1 %v28_v2  ;;  %v21_v6 = vld [vmem:[%s399_s0] sm:$0xff]  ;;  %v24_v9 = vld [vmem:[%s399_s0 + $0x18] sm:$0xff] }
   0x8   :  { %255 = vmatprep.subr.mxu0 %v27_v3  ;;  %270 = vmatprep.subr.mxu1 %v27_v3  ;;  %v232_v12 = vld [vmem:[%s401_s2] ss:$0 sm:$0xff] }
   0x9   :  { %256 = vmatpush3.msra.mxu0 %v27_v3  ;;  %276 = vmatpush3.msra.mxu1 %v27_v3  ;;  %v237_v56 = vld [vmem:[%s402_s3] ss:$0 sm:$0xff]  ;;  %s312_s3 = smov [#allocation2]  }
   0xa   :  { %257 = vmatprep.subr.mxu0 %v26_v4  ;;  %271 = vmatprep.subr.mxu1 %v26_v4  ;;  %v238_v58 = vld [vmem:[%s403_s4] ss:$0 sm:$0xff]  ;;  %s221_s16 = sshll.u32 %s312_s3, 4  ;;  %s222_s16 = int_to_ptr.vmem [resolvable:$true] %s221_s16 }
   0xb   :  { %258 = vmatpush3.msra.mxu0 %v26_v4  ;;  %277 = vmatpush3.msra.mxu1 %v26_v4  ;;  %s290_s4 = scalar_lea.vmem %s222_s16, 512  ;;  %p295_p1 = scmp.lt.s32.totalorder %s222_s16, %s222_s16 }
   0xc   :  { %259 = vmatprep.subr.mxu0 %v25_v5  ;;  %272 = vmatprep.subr.mxu1 %v25_v5  ;;  %p291_p0 = scmp.ne.s32.totalorder %s222_s16, %s290_s4  ;;  %p296_p2 = scmp.lt.s32.totalorder %s290_s4, %s290_s4 }
   0xd   :  { %260 = vmatpush3.msra.mxu0 %v25_v5  ;;  %278 = vmatpush3.msra.mxu1 %v25_v5 }
   0xe   :  { %261 = vmatprep.mubr.msk.f32.mxu0 %vm38_vm0, %v21_v6  ;;  %264 = vmatprep.mubr.msk.f32.mxu1 %vm38_vm0, %v23_v7  ;;  %p297_p3 = por %p296_p2, %p295_p1 }
   0xf   :  { %262 = vmatmul.mubr.msk.f32.vlgmr.msra.gmra.mxu0 %vm38_vm0, %v22_v8  ;;  %265 = vmatmul.mubr.msk.f32.vlgmr.msra.gmra.mxu1 %vm38_vm0, %v24_v9 }
  0x10   :  { %p298_p4 = pnand %p297_p3, %p291_p0 }
  0xcf   :  { %v263_v10 = vpop.f32.mrf.mxu0  ;;  %v266_v11 = vpop.f32.mrf.mxu1 }
  0xd0   :  { %v123_v17 = vadd.f32 %v263_v10, %v232_v12  ;;  %v133_v18 = vadd.f32 %v266_v11, %v232_v12 }
  0xd1   :  { %v117_v13 = vpop.f32.mrf.mxu0  ;;  %v127_v14 = vpop.f32.mrf.mxu1 }
  0xd2   :  { %v118_v15 = vadd.f32 %v232_v12, %v117_v13  ;;  %v128_v16 = vadd.f32 %v232_v12, %v127_v14  ;;  %v146_v21 = vsel %vm136_vm1, %v133_v18, 0.0  ;;  %v140_v22 = vsel %vm136_vm1, %v123_v17, 0.0 }
  0xd4   :  { %v143_v19 = vsel %vm136_vm1, %v128_v16, 0.0  ;;  %v137_v20 = vsel %vm136_vm1, %v118_v15, 0.0 }
  0xd5   :  { %144 = vadd.xlane.f32.xlu1 %v143_v19  ;;  %138 = vadd.xlane.f32.xlu0 %v137_v20 }
  0xd9   :  { %147 = vadd.xlane.f32.xlu1 %v146_v21  ;;  %141 = vadd.xlane.f32.xlu0 %v140_v22 }
 0x15e   :  { %v145_v23 = vpop.xlane.xlu1 %144  ;;  %v139_v24 = vpop.xlane.xlu0 %138 }
 0x15f   :  { %v152_v25 = vmul.f32 0.03125, %v145_v23  ;;  %v150_v26 = vmul.f32 0.03125, %v139_v24 }
 0x161   :  { %v156_v27 = vsub.f32 %v128_v16, %v152_v25  ;;  %v154_v28 = vsub.f32 %v118_v15, %v150_v26 }
 0x162   :  { %v148_v29 = vpop.xlane.xlu1 %147  ;;  %v142_v30 = vpop.xlane.xlu0 %141 }
 0x163   :  { %v153_v31 = vmul.f32 0.03125, %v148_v29  ;;  %v151_v32 = vmul.f32 0.03125, %v142_v30  ;;  %v158_v33 = vmul.f32 %v154_v28, %v154_v28  ;;  %v160_v37 = vmul.f32 %v156_v27, %v156_v27 }
 0x165   :  { %v157_v34 = vsub.f32 %v133_v18, %v153_v31  ;;  %v155_v35 = vsub.f32 %v123_v17, %v151_v32  ;;  %v162_v36 = vsel %vm136_vm1, %v158_v33, 0.0  ;;  %v168_v39 = vsel %vm136_vm1, %v160_v37, 0.0 }
 0x166   :  { %163 = vadd.xlane.f32.xlu0 %v162_v36 }
 0x167   :  { %v159_v38 = vmul.f32 %v155_v35, %v155_v35  ;;  %v161_v41 = vmul.f32 %v157_v34, %v157_v34 }
 0x169   :  { %v165_v40 = vsel %vm136_vm1, %v159_v38, 0.0  ;;  %v171_v42 = vsel %vm136_vm1, %v161_v41, 0.0 }
 0x16a   :  { %169 = vadd.xlane.f32.xlu0 %v168_v39  ;;  %166 = vadd.xlane.f32.xlu1 %v165_v40 }
 0x16e   :  { %172 = vadd.xlane.f32.xlu1 %v171_v42 }
 0x1ef   :  { %v164_v43 = vpop.xlane.xlu0 %163 }
 0x1f0   :  { %v174_v44 = vmul.f32 0.03125, %v164_v43 }
 0x1f2   :  { %v178_v45 = vadd.f32 1e-05, %v174_v44 }
 0x1f3   :  { %v167_v46 = vpop.xlane.xlu1 %166  ;;  %v170_v47 = vpop.xlane.xlu0 %169 }
 0x1f4   :  { %282 = vrsqrt.f32 %v178_v45  ;;  %v175_v48 = vmul.f32 0.03125, %v167_v46  ;;  %v176_v49 = vmul.f32 0.03125, %v170_v47 }
 0x1f6   :  { %v179_v50 = vadd.f32 1e-05, %v175_v48  ;;  %v180_v51 = vadd.f32 1e-05, %v176_v49 }
 0x1f7   :  { %v173_v52 = vpop.xlane.xlu1 %172 }
 0x1f8   :  { %284 = vrsqrt.f32 %v179_v50  ;;  %v177_v53 = vmul.f32 0.03125, %v173_v52 }
 0x1f9   :  { %286 = vrsqrt.f32 %v180_v51 }
 0x1fa   :  { %v181_v54 = vadd.f32 1e-05, %v177_v53 }
 0x1fc   :  { %288 = vrsqrt.f32 %v181_v54 }
 0x201   :  { %v283_v55 = vpop.eup %282 }
 0x202   :  { %v186_v57 = vmul.f32 %v283_v55, %v154_v28 }
 0x204   :  { %v197_v59 = vmul.f32 %v237_v56, %v186_v57 }
 0x205   :  { %v285_v60 = vpop.eup %284 }
 0x206   :  { %v287_v61 = vpop.eup %286  ;;  %v187_v62 = vmul.f32 %v285_v60, %v155_v35  ;;  %v208_v63 = vadd.f32 %v238_v58, %v197_v59 }
 0x207   :  { %v188_v0 = vmul.f32 %v287_v61, %v156_v27 }
 0x208   :  { %v198_v1 = vmul.f32 %v237_v56, %v187_v62  ;;  %212 = vst.msk [vmem:[#allocation2] sm:$0xff] %vm136_vm1, %v208_v63 }
 0x209   :  { %v289_v2 = vpop.eup %288  ;;  %v199_v3 = vmul.f32 %v237_v56, %v188_v0 }
 0x20a   :  { %v189_v4 = vmul.f32 %v289_v2, %v157_v34  ;;  %v209_v5 = vadd.f32 %v238_v58, %v198_v1 }
 0x20b   :  { %v210_v6 = vadd.f32 %v238_v58, %v199_v3 }
 0x20c   :  { %v200_v7 = vmul.f32 %v237_v56, %v189_v4  ;;  %213 = vst.msk [vmem:[#allocation2 + $0x8] sm:$0xff] %vm136_vm1, %v209_v5 }
 0x20d   :  { %214 = vst.msk [vmem:[#allocation2 + $0x10] sm:$0xff] %vm136_vm1, %v210_v6 }
 0x20e   :  { %v211_v8 = vadd.f32 %v238_v58, %v200_v7 }
 0x210   :  { %215 = vst.msk [vmem:[#allocation2 + $0x18] sm:$0xff] %vm136_vm1, %v211_v8 }
 0x211   :  { %301 = shalt.err (!%p298_p4)
}
 0x212   :  { %s313_s17 = smov 128   ;;  %s314_s18 = smov 8  }
 0x213   :  { %227 = dma.vmem_to_hbm [thread:$0]  %s222_s16, 512, %s404_s5, [#allocation3], %s313_s17, %s313_s17, %s314_s18  }
 0x214   :  { %310 = dma.done.wait [#allocation3], 512  }
 0x215   :  { %311 = vsyncadd [#allocation3], 4294966784 }
 0x216   :  { %231 = vsyncpa [#allocation3], 1 }

</bundles_post_ra>
